<compile_context>
chip_gen: v5e
topology: v5e:2x2
jax: 0.10.0
libtpu: 0.0.40
codegen_flags: <defaults>
</compile_context>

<pallas_src>
from functools import partial

import jax
import jax.numpy as jnp
from jax.experimental import pallas as pl
from jax.experimental.pallas import tpu as pltpu


def _copy_kernel(x_ref, o_ref):
    # Identity forward: move the tile straight through VMEM.
    o_ref[...] = x_ref[...]


def _identity_lane_dense(x2d: jax.Array) -> jax.Array:
    """Copy a (rows, 128)-shaped array with a lane-dense tiled Pallas kernel."""
    rows, lanes = x2d.shape
    block_rows = rows if rows <= 512 else 512  # full extent or a multiple of 8
    grid = (pl.cdiv(rows, block_rows),)
    return pl.pallas_call(
        _copy_kernel,
        out_shape=jax.ShapeDtypeStruct((rows, lanes), x2d.dtype),
        grid=grid,
        in_specs=[pl.BlockSpec((block_rows, lanes), lambda i: (i, 0))],
        out_specs=pl.BlockSpec((block_rows, lanes), lambda i: (i, 0)),
        compiler_params=pltpu.CompilerParams(
            dimension_semantics=("parallel",),
        ),
    )(x2d)


def _identity_full_block(x: jax.Array) -> jax.Array:
    """Fallback for shapes whose element count is not a multiple of 128:
    a single full-extent block (always layout-legal)."""
    zeros = (0,) * x.ndim
    return pl.pallas_call(
        _copy_kernel,
        out_shape=jax.ShapeDtypeStruct(x.shape, x.dtype),
        in_specs=[pl.BlockSpec(x.shape, lambda: zeros)],
        out_specs=pl.BlockSpec(x.shape, lambda: zeros),
    )(x)


@jax.jit
def my_classifier_forward(x: jax.Array) -> jax.Array:
    """Pallas implementation of MyClassifier.forward (identity)."""
    n = x.size
    if n % 128 == 0:
        x2d = x.reshape(n // 128, 128)       # free row-major bitcast reshape
        y2d = _identity_lane_dense(x2d)
        return y2d.reshape(x.shape)
    return _identity_full_block(x)


if __name__ == "__main__":
    key = jax.random.PRNGKey(0)
    # Small NCHW-style input consistent with an image-classifier forward.
    x = jax.random.normal(key, (2, 4, 16, 16), dtype=jnp.float32)

    y = my_classifier_forward(x)
    jax.block_until_ready(y)

    assert y.shape == x.shape and y.dtype == x.dtype
    assert bool(jnp.all(y == x))
    print("KERNEL_OK")
</pallas_src>

<mosaic_0001>
module attributes {stable_mosaic.version = 11 : i64} {
  func.func @_copy_kernel(%arg0: i32, %arg1: memref<16x128xf32, #tpu.memory_space<vmem>>, %arg2: memref<16x128xf32, #tpu.memory_space<vmem>>) attributes {dimension_semantics = [#tpu.dimension_semantics<parallel>], iteration_bounds = array<i64: 1>, scalar_prefetch = 0 : i64, scratch_operands = 0 : i64, tpu.core_type = #tpu.core_type<tc>, window_params = [{transform_indices = @transform_0, window_bounds = array<i64: 16, 128>}, {transform_indices = @transform_1, window_bounds = array<i64: 16, 128>}]} {
    %c0 = arith.constant 0 : index
    %c0_0 = arith.constant 0 : index
    %0 = vector.load %arg1[%c0, %c0_0] : memref<16x128xf32, #tpu.memory_space<vmem>>, vector<16x128xf32>
    %c0_1 = arith.constant 0 : index
    %c0_2 = arith.constant 0 : index
    %1 = vector.load %arg2[%c0_1, %c0_2] : memref<16x128xf32, #tpu.memory_space<vmem>>, vector<16x128xf32>
    tpu.vector_store %arg2[%c0_1, %c0_2], %0 {strides = array<i32>} : memref<16x128xf32, #tpu.memory_space<vmem>>, vector<16x128xf32>,
    return
  }
  func.func @transform_0(%arg0: i32) -> (i32, i32) {
    %c0_i32 = arith.constant 0 : i32
    %c0_i32_0 = arith.constant 0 : i32
    return %arg0, %c0_i32 : i32, i32
  }
  func.func @transform_1(%arg0: i32) -> (i32, i32) {
    %c0_i32 = arith.constant 0 : i32
    %c0_i32_0 = arith.constant 0 : i32
    return %arg0, %c0_i32 : i32, i32
  }
}

</mosaic_0001>

<bundles_post_ra>
// kernel: my_classifier_forward.1
= control target key start
LH: loop header
LB: loop body
LE: loop exit
PB: predicated region body
PF: predicated region fallthrough
CT: control target
= control target key end

     0   :  { %s38_s0 = inlined_call_operand.vmem [shape: f32[16,128], index: 0, kind: input, shape index: {}]   ;;  %s39_s1 = inlined_call_operand.vmem [shape: f32[16,128], index: 1, kind: output, shape index: {}]  }
   0x1   :  { %v8_v0 = vld [vmem:[%s38_s0] sm:$0xff]  ;;  %v9_v1 = vld [vmem:[%s38_s0 + $0x8] sm:$0xff] }
   0x2   :  { %10 = vst [vmem:[%s39_s1] sm:$0xff] %v8_v0 }
   0x3   :  { %11 = vst [vmem:[%s39_s1 + $0x8] sm:$0xff] %v9_v1 }

</bundles_post_ra>
